<compile_context>
chip_gen: v5e
topology: v5e:2x2
jax: 0.10.0
libtpu: 0.0.40
codegen_flags: <defaults>
</compile_context>

<pallas_src>
import functools

import jax
import jax.numpy as jnp
from jax.experimental import pallas as pl
from jax.experimental.pallas import tpu as pltpu

LANE = 128


def _mse_partial_kernel(x_ref, y_ref, o_ref, *, tile_rows, blocks_per_core,
                        rows_valid, ragged):
    # Grid = (cores, blocks_per_core).  o_ref is an (8, 128) f32 partial-sum block that stays
    # resident in VMEM across the inner (reduction) axis.
    c = pl.program_id(0)
    i = pl.program_id(1)

    @pl.when(i == 0)
    def _init():
        o_ref[...] = jnp.zeros_like(o_ref)

    def sq_diff():
        d = x_ref[...].astype(jnp.float32) - y_ref[...].astype(jnp.float32)
        return d * d

    def accumulate(dd):
        # VPU-only reduction of the (tile_rows, 128) block down to one (8, 128) vreg.
        o_ref[...] += jnp.sum(dd.reshape(tile_rows // 8, 8, LANE), axis=0)

    if not ragged:
        # Hot path: every block is full and in-range -> no mask, no gating.
        accumulate(sq_diff())
    else:
        base = (c * blocks_per_core + i) * tile_rows  # unclamped block start row

        @pl.when(base + tile_rows <= rows_valid)
        def _interior():
            accumulate(sq_diff())

        @pl.when(jnp.logical_and(base < rows_valid, base + tile_rows > rows_valid))
        def _boundary():
            # Only the boundary block pays for the iota+compare+select mask.  OOB rows of the
            # boundary block contain unspecified data; jnp.where zeroes them after the square.
            dd = sq_diff()
            row_ids = jax.lax.broadcasted_iota(jnp.int32, dd.shape, 0) + base
            accumulate(jnp.where(row_ids < rows_valid, dd, 0.0))
        # Fully out-of-range blocks (clamped duplicates on the 2-core split) accumulate nothing.


def _sublane_min(dtype):
    # Minimum second-to-last block dim for packed dtypes: f32 -> 8, bf16 -> 16, int8/fp8 -> 32.
    return {4: 8, 2: 16, 1: 32}.get(jnp.dtype(dtype).itemsize, 8)


def _round_up(a, b):
    return ((a + b - 1) // b) * b


def _num_tensorcores():
    """Best-effort TensorCore-per-chip count; falls back to 1 (always correct)."""
    try:
        info = pltpu.get_tpu_info()
        for attr in ("num_cores", "core_count", "num_tensorcores", "tensor_cores_per_chip"):
            v = getattr(info, attr, None)
            if isinstance(v, int) and not isinstance(v, bool) and v >= 1:
                return v
    except Exception:
        pass
    try:
        kind = jax.devices()[0].device_kind.lower()
        if "v7" in kind:
            return 2
    except Exception:
        pass
    return 1


def mse_loss(x, y, *, tile_rows=4096):
    """mean((x - y)**2), computed in f32, streaming both operands in native dtype."""
    assert x.shape == y.shape, "input and target must have the same shape"
    n = x.size
    if n == 0:
        return jnp.float32(0.0)

    xf = x.reshape(-1)
    yf = y.reshape(-1)

    # Handle the <128-element ragged tail with plain jnp (no full-array pad/copy).
    rem = n % LANE
    n_main = n - rem
    tail_sum = jnp.float32(0.0)
    if rem:
        tx = xf[n_main:].astype(jnp.float32)
        ty = yf[n_main:].astype(jnp.float32)
        tail_sum = jnp.sum((tx - ty) ** 2)
    if n_main == 0:
        return tail_sum * (1.0 / float(n))

    rows = n_main // LANE
    if rem:
        x2 = xf[:n_main].reshape(rows, LANE)
        y2 = yf[:n_main].reshape(rows, LANE)
    else:
        x2 = xf.reshape(rows, LANE)
        y2 = yf.reshape(rows, LANE)

    sub = max(_sublane_min(x.dtype), _sublane_min(y.dtype))
    itemsize = max(jnp.dtype(x.dtype).itemsize, jnp.dtype(y.dtype).itemsize)

    # Cap the tile so 2 inputs x 2 pipeline buffers stay within ~32 MiB of VMEM
    # (safe even on v7x, where physical VMEM is 64 MiB).
    tr_cap = (32 << 20) // (2 * 2 * LANE * itemsize)
    tr = max(sub, min(_round_up(min(tile_rows, tr_cap), sub), _round_up(rows, sub)))

    n_blocks = pl.cdiv(rows, tr)
    # 2-way TensorCore split only where it actually provides parallelism (v7x).
    hw_cores = _num_tensorcores()
    n_cores = 2 if (hw_cores >= 2 and n_blocks >= 2) else 1
    bpc = pl.cdiv(n_blocks, n_cores)
    ragged = (n_cores * bpc * tr) != rows

    kernel = functools.partial(
        _mse_partial_kernel,
        tile_rows=tr,
        blocks_per_core=bpc,
        rows_valid=rows,
        ragged=ragged,
    )

    def in_map(c, i):
        # Clamp so DMAs never start past the array.  The clamped duplicate (only possible as
        # the last core's last step) has the same block index as the previous step, so the
        # pipeline skips the re-fetch, and the kernel skips its accumulation via pl.when.
        return (jnp.minimum(c * bpc + i, n_blocks - 1), 0)

    in_bytes = rows * LANE * (jnp.dtype(x.dtype).itemsize + jnp.dtype(y.dtype).itemsize)
    out_bytes = n_cores * 8 * LANE * 4
    vmem_need = 2 * 2 * tr * LANE * itemsize + 2 * 8 * LANE * 4
    vmem_limit = int(min(max(vmem_need + (4 << 20), 16 << 20), 64 << 20))

    partials = pl.pallas_call(
        kernel,
        out_shape=jax.ShapeDtypeStruct((n_cores, 8, LANE), jnp.float32),
        grid_spec=pltpu.PrefetchScalarGridSpec(
            num_scalar_prefetch=0,
            grid=(n_cores, bpc),
            in_specs=[
                pl.BlockSpec((tr, LANE), in_map),
                pl.BlockSpec((tr, LANE), in_map),
            ],
            out_specs=pl.BlockSpec((None, 8, LANE), lambda c, i: (c, 0, 0)),
        ),
        compiler_params=pltpu.CompilerParams(
            dimension_semantics=("parallel", "arbitrary"),
            vmem_limit_bytes=vmem_limit,
        ),
        cost_estimate=pl.CostEstimate(
            flops=3 * rows * LANE,
            transcendentals=0,
            bytes_accessed=int(in_bytes + out_bytes),
        ),
    )(x2, y2)

    # Tiny final reduce (<= 2 * 8 * 128 elems) + 1/N scale done outside the kernel.
    return (jnp.sum(partials) + tail_sum) * (1.0 / float(n))


# Alias matching the IDEC module method name.
recon_loss = mse_loss


if __name__ == "__main__":
    key = jax.random.PRNGKey(0)
    k1, k2, k3, k4, k5, k6 = jax.random.split(key, 6)

    # Case 1: NCHW-style reconstruction pair (evenly tiled path, no mask).
    x1 = jax.random.normal(k1, (2, 4, 16, 16), dtype=jnp.float32)
    t1 = jax.random.normal(k2, (2, 4, 16, 16), dtype=jnp.float32)
    l1 = jax.block_until_ready(mse_loss(x1, t1))
    r1 = jnp.mean((x1 - t1) ** 2)
    assert jnp.allclose(l1, r1, rtol=1e-5, atol=1e-6), (l1, r1)

    # Case 2: IDEC-style (batch, input_dim) pair -> ragged row count (boundary-mask path).
    x2 = jax.random.normal(k3, (8, 784), dtype=jnp.float32)
    t2 = jax.random.normal(k4, (8, 784), dtype=jnp.float32)
    l2 = jax.block_until_ready(mse_loss(x2, t2))
    r2 = jnp.mean((x2 - t2) ** 2)
    assert jnp.allclose(l2, r2, rtol=1e-5, atol=1e-6), (l2, r2)

    # Case 3: bf16 inputs streamed natively, upcast to f32 inside the kernel.
    x3 = x2.astype(jnp.bfloat16)
    t3 = t2.astype(jnp.bfloat16)
    l3 = jax.block_until_ready(mse_loss(x3, t3))
    r3 = jnp.mean((x3.astype(jnp.float32) - t3.astype(jnp.float32)) ** 2)
    assert jnp.allclose(l3, r3, rtol=1e-4, atol=1e-5), (l3, r3)

    # Case 4: numel not a multiple of 128 -> exercises the no-pad tail path.
    x4 = jax.random.normal(k5, (5, 77), dtype=jnp.float32)
    t4 = jax.random.normal(k6, (5, 77), dtype=jnp.float32)
    l4 = jax.block_until_ready(mse_loss(x4, t4))
    r4 = jnp.mean((x4 - t4) ** 2)
    assert jnp.allclose(l4, r4, rtol=1e-5, atol=1e-6), (l4, r4)

    print("KERNEL_OK")
</pallas_src>

<mosaic_0001>
module attributes {stable_mosaic.version = 11 : i64} {
  func.func @_mse_partial_kernel(%arg0: i32, %arg1: i32, %arg2: memref<16x128xf32, #tpu.memory_space<vmem>>, %arg3: memref<16x128xf32, #tpu.memory_space<vmem>>, %arg4: memref<1x8x128xf32, #tpu.memory_space<vmem>>) attributes {dimension_semantics = [#tpu.dimension_semantics<parallel>, #tpu.dimension_semantics<arbitrary>], iteration_bounds = array<i64: 1, 1>, scalar_prefetch = 0 : i64, scratch_operands = 0 : i64, tpu.core_type = #tpu.core_type<tc>, window_params = [{transform_indices = @transform_0, window_bounds = array<i64: 16, 128>}, {transform_indices = @transform_1, window_bounds = array<i64: 16, 128>}, {transform_indices = @transform_2, window_bounds = array<i64: 1, 8, 128>}]} {
    %c0_i32 = arith.constant 0 : i32
    %0 = arith.cmpi eq, %arg1, %c0_i32 : i32
    %1 = arith.extui %0 : i1 to i32
    %c0_i32_0 = arith.constant 0 : i32
    %2 = arith.cmpi ne, %1, %c0_i32_0 : i32
    scf.if %2 {
      %cst_10 = arith.constant 0.000000e+00 : f32
      %15 = vector.broadcast %cst_10 : f32 to vector<8x128xf32>
      %c0_11 = arith.constant 0 : index
      %c0_12 = arith.constant 0 : index
      %c0_13 = arith.constant 0 : index
      %16 = vector.load %arg4[%c0_11, %c0_12, %c0_13] : memref<1x8x128xf32, #tpu.memory_space<vmem>>, vector<1x8x128xf32>
      %17 = vector.shape_cast %16 : vector<1x8x128xf32> to vector<8x128xf32>
      %18 = vector.shape_cast %15 : vector<8x128xf32> to vector<1x8x128xf32>
      tpu.vector_store %arg4[%c0_11, %c0_12, %c0_13], %18 {strides = array<i32>} : memref<1x8x128xf32, #tpu.memory_space<vmem>>, vector<1x8x128xf32>,
    } else {
    }
    %c0 = arith.constant 0 : index
    %c0_1 = arith.constant 0 : index
    %3 = vector.load %arg2[%c0, %c0_1] : memref<16x128xf32, #tpu.memory_space<vmem>>, vector<16x128xf32>
    %c0_2 = arith.constant 0 : index
    %c0_3 = arith.constant 0 : index
    %4 = vector.load %arg3[%c0_2, %c0_3] : memref<16x128xf32, #tpu.memory_space<vmem>>, vector<16x128xf32>
    %5 = arith.subf %3, %4 : vector<16x128xf32>
    %6 = arith.mulf %5, %5 : vector<16x128xf32>
    %c0_4 = arith.constant 0 : index
    %c0_5 = arith.constant 0 : index
    %c0_6 = arith.constant 0 : index
    %7 = vector.load %arg4[%c0_4, %c0_5, %c0_6] : memref<1x8x128xf32, #tpu.memory_space<vmem>>, vector<1x8x128xf32>
    %8 = vector.shape_cast %7 : vector<1x8x128xf32> to vector<8x128xf32>
    %9 = vector.shape_cast %6 : vector<16x128xf32> to vector<2x8x128xf32>
    %cst = arith.constant dense<0.000000e+00> : vector<8x128xf32>
    %10 = vector.multi_reduction <add>, %9, %cst [0] : vector<2x8x128xf32> to vector<8x128xf32>
    %11 = arith.addf %8, %10 : vector<8x128xf32>
    %c0_7 = arith.constant 0 : index
    %c0_8 = arith.constant 0 : index
    %c0_9 = arith.constant 0 : index
    %12 = vector.load %arg4[%c0_7, %c0_8, %c0_9] : memref<1x8x128xf32, #tpu.memory_space<vmem>>, vector<1x8x128xf32>
    %13 = vector.shape_cast %12 : vector<1x8x128xf32> to vector<8x128xf32>
    %14 = vector.shape_cast %11 : vector<8x128xf32> to vector<1x8x128xf32>
    tpu.vector_store %arg4[%c0_7, %c0_8, %c0_9], %14 {strides = array<i32>} : memref<1x8x128xf32, #tpu.memory_space<vmem>>, vector<1x8x128xf32>,
    return
  }
  func.func @transform_0(%arg0: i32, %arg1: i32) -> (i32, i32) {
    %c1_i32 = arith.constant 1 : i32
    %0 = arith.muli %arg0, %c1_i32 : i32
    %1 = arith.addi %0, %arg1 : i32
    %c0_i32 = arith.constant 0 : i32
    %2 = arith.minsi %1, %c0_i32 : i32
    %c0_i32_0 = arith.constant 0 : i32
    %c0_i32_1 = arith.constant 0 : i32
    return %2, %c0_i32_0 : i32, i32
  }
  func.func @transform_1(%arg0: i32, %arg1: i32) -> (i32, i32) {
    %c1_i32 = arith.constant 1 : i32
    %0 = arith.muli %arg0, %c1_i32 : i32
    %1 = arith.addi %0, %arg1 : i32
    %c0_i32 = arith.constant 0 : i32
    %2 = arith.minsi %1, %c0_i32 : i32
    %c0_i32_0 = arith.constant 0 : i32
    %c0_i32_1 = arith.constant 0 : i32
    return %2, %c0_i32_0 : i32, i32
  }
  func.func @transform_2(%arg0: i32, %arg1: i32) -> (i32, i32, i32) {
    %c0_i32 = arith.constant 0 : i32
    %c0_i32_0 = arith.constant 0 : i32
    %c0_i32_1 = arith.constant 0 : i32
    return %arg0, %c0_i32, %c0_i32_0 : i32, i32, i32
  }
}

</mosaic_0001>

<bundles_post_ra>
// kernel: tpu_custom_call.1
= control target key start
LH: loop header
LB: loop body
LE: loop exit
PB: predicated region body
PF: predicated region fallthrough
CT: control target
= control target key end

     0   :  { %7 = vsyncpa [#allocation3], 0  ;;  %s216_s0 = inlined_call_operand.hbm [shape: f32[16,128], index: 0, kind: input, shape index: {}]   ;;  %s217_s1 = inlined_call_operand.hbm [shape: f32[16,128], index: 1, kind: input, shape index: {}]   ;;  %s218_s2 = inlined_call_operand.hbm [shape: f32[1,8,128], index: 2, kind: output, shape index: {}]  }
   0x1   :  { %8 = vsyncpa [#allocation6], 0 }
   0x2   :  { %9 = vsyncpa [#allocation4], 0  ;;  %s20_s11 = sshll.u32 %s216_s0, 4  ;;  %s187_s12 = smov [#allocation2]   ;;  %s21_s11 = int_to_ptr.hbm [resolvable:$true] %s20_s11 }
   0x3   :  { %s22_s13 = sshll.u32 %s187_s12, 4  ;;  %s39_s16 = sshll.u32 %s217_s1, 4  ;;  %s23_s13 = int_to_ptr.vmem [resolvable:$true] %s22_s13  ;;  %s40_s16 = int_to_ptr.hbm [resolvable:$true] %s39_s16 }
   0x4   :  { %s188_s17 = smov 128   ;;  %s189_s18 = smov 8  }
   0x5   :  { %28 = dma.hbm_to_vmem [thread:$0]  %s21_s11, 256, %s23_s13, [#allocation3], %s188_s17, %s188_s17, %s189_s18  }
   0x6   :  { %s190_s19 = smov [#allocation5]  }
   0x7   :  { %s41_s20 = sshll.u32 %s190_s19, 4  ;;  %s42_s20 = int_to_ptr.vmem [resolvable:$true] %s41_s20 }
   0x8   :  { %47 = dma.hbm_to_vmem [thread:$0]  %s40_s16, 256, %s42_s20, [#allocation6], %s188_s17, %s188_s17, %s189_s18  }
   0x9   :  { %181 = dma.done.wait [#allocation3], 256  }
   0xa   :  { %182 = vsyncadd [#allocation3], 4294967040 }
   0xb   :  { %183 = dma.done.wait [#allocation6], 256  }
   0xc   :  { %184 = vsyncadd [#allocation6], 4294967040  ;;  %v69_v0 = vld [vmem:[#allocation2] sm:$0xff]  ;;  %v70_v1 = vld [vmem:[#allocation2 + $0x8] sm:$0xff]  ;;  %s191_s0 = smov [#allocation7]   ;;  %s88_s23 = sshll.u32 %s218_s2, 4  ;;  %s89_s23 = int_to_ptr.hbm [resolvable:$true] %s88_s23 }
   0xd   :  { %v71_v2 = vld [vmem:[#allocation5] sm:$0xff]  ;;  %v72_v3 = vld [vmem:[#allocation5 + $0x8] sm:$0xff]  ;;  %s86_s1 = sshll.u32 %s191_s0, 4  ;;  %s87_s1 = int_to_ptr.vmem [resolvable:$true] %s86_s1 }
   0xe   :  { %v73_v4 = vsub.f32 %v69_v0, %v71_v2  ;;  %v74_v5 = vsub.f32 %v70_v1, %v72_v3 }
  0x10   :  { %v75_v6 = vmul.f32 %v73_v4, %v73_v4  ;;  %v76_v7 = vmul.f32 %v74_v5, %v74_v5 }
  0x12   :  { %v78_v8 = vadd.f32 %v76_v7, %v75_v6 }
  0x14   :  { %80 = vst [vmem:[#allocation7] sm:$0xff] %v78_v8 }
  0x15   :  { %91 = dma.vmem_to_hbm [thread:$0]  %s87_s1, 128, %s89_s23, [#allocation4]  }
  0x16   :  { %185 = dma.done.wait [#allocation4], 128  }
  0x17   :  { %186 = vsyncadd [#allocation4], 4294967168 }
  0x18   :  { %96 = vsyncpa [#allocation3], 1 }
  0x19   :  { %97 = vsyncpa [#allocation6], 1 }
  0x1a   :  { %98 = vsyncpa [#allocation4], 1 }

</bundles_post_ra>
